<compile_context>
chip_gen: v6e
topology: v6e:2x2x1
jax: 0.10.0
libtpu: 0.0.40
codegen_flags: <defaults>
</compile_context>

<pallas_src>
import functools

import jax
import jax.numpy as jnp
import numpy as np
from jax.experimental import pallas as pl
from jax.experimental.pallas import tpu as pltpu


# ----------------------------------------------------------------------------
# Kernel: gather TOK_BLOCK embedding rows via manual DMA, scale, store.
# ----------------------------------------------------------------------------
def embed_kernel(ids_ref, emb_hbm, o_ref, row_buf, sems, *, tok_block, d_model):
    step = pl.program_id(0)
    base = step * tok_block

    # Issue all row-gather DMAs first so they overlap each other.
    copies = []
    for t in range(tok_block):                    # static, fully unrolled
        tok = ids_ref[base + t]                   # scalar read from SMEM
        cp = pltpu.make_async_copy(
            emb_hbm.at[pl.ds(tok, 1), :],         # (1, d_model) row in HBM
            row_buf.at[pl.ds(t, 1), :],           # (1, d_model) slot in VMEM
            sems.at[t],
        )
        cp.start()
        copies.append(cp)
    for cp in copies:
        cp.wait()

    scale = jnp.sqrt(jnp.float32(d_model))
    o_ref[...] = row_buf[...].astype(jnp.float32) * scale


# ----------------------------------------------------------------------------
# Wrapper
# ----------------------------------------------------------------------------
def input_embedding(ids, emb_table, *, tok_block=8):
    """ids: (B, S) int32 token ids; emb_table: (vocab, d_model) f32."""
    B, S = ids.shape
    V, D = emb_table.shape
    N = B * S
    n_pad = pl.cdiv(N, tok_block) * tok_block

    ids_flat = ids.reshape(N).astype(jnp.int32)
    if n_pad != N:
        # pad with token 0 (rows are sliced off afterwards)
        ids_flat = jnp.concatenate(
            [ids_flat, jnp.zeros((n_pad - N,), jnp.int32)])

    kernel = functools.partial(embed_kernel, tok_block=tok_block, d_model=D)

    out = pl.pallas_call(
        kernel,
        out_shape=jax.ShapeDtypeStruct((n_pad, D), jnp.float32),
        grid_spec=pltpu.PrefetchScalarGridSpec(
            num_scalar_prefetch=1,                       # ids -> SMEM
            grid=(n_pad // tok_block,),
            in_specs=[
                pl.BlockSpec(memory_space=pl.ANY),       # embedding table in HBM
            ],
            out_specs=pl.BlockSpec((tok_block, D), lambda i, ids: (i, 0)),
            scratch_shapes=[
                pltpu.VMEM((tok_block, D), emb_table.dtype),   # gathered rows
                pltpu.SemaphoreType.DMA((tok_block,)),         # one sem per row DMA
            ],
        ),
        compiler_params=pltpu.CompilerParams(
            dimension_semantics=("parallel",),
        ),
    )(ids_flat, emb_table)

    return out[:N].reshape(B, S, D)


# ----------------------------------------------------------------------------
# Pure-JAX reference (mirrors the PyTorch forward)
# ----------------------------------------------------------------------------
def input_embedding_ref(ids, emb_table):
    d_model = emb_table.shape[1]
    return emb_table[ids] * jnp.sqrt(jnp.float32(d_model))


if __name__ == "__main__":
    B, S = 2, 8
    VOCAB, D_MODEL = 64, 128          # d_model = 128 -> lane-dense stores

    key = jax.random.PRNGKey(0)
    k_ids, k_emb = jax.random.split(key)

    ids = jax.random.randint(k_ids, (B, S), 0, VOCAB, dtype=jnp.int32)
    emb_table = jax.random.normal(k_emb, (VOCAB, D_MODEL), jnp.float32)

    out = input_embedding(ids, emb_table)
    out = jax.block_until_ready(out)

    ref = input_embedding_ref(ids, emb_table)
    np.testing.assert_allclose(np.asarray(out), np.asarray(ref),
                               rtol=1e-6, atol=1e-6)

    print("KERNEL_OK")
</pallas_src>

<mosaic_0001>
module attributes {stable_mosaic.version = 11 : i64} {
  func.func @embed_kernel(%arg0: i32, %arg1: memref<16xi32, #tpu.memory_space<smem>>, %arg2: memref<64x128xf32, #tpu.memory_space<any>>, %arg3: memref<8x128xf32, #tpu.memory_space<vmem>>, %arg4: memref<8x128xf32, #tpu.memory_space<vmem>>, %arg5: memref<8x!tpu.dma_semaphore, #tpu.memory_space<semaphore_mem>>) attributes {dimension_semantics = [#tpu.dimension_semantics<parallel>], iteration_bounds = array<i64: 2>, scalar_prefetch = 1 : i64, scratch_operands = 2 : i64, tpu.core_type = #tpu.core_type<tc>, window_params = [{}, {transform_indices = @transform_1, window_bounds = array<i64: 8, 128>}]} {
    %c8_i32 = arith.constant 8 : i32
    %0 = arith.muli %arg0, %c8_i32 : i32
    %c0_i32 = arith.constant 0 : i32
    %1 = arith.addi %0, %c0_i32 : i32
    %2 = arith.index_cast %1 : i32 to index
    %3 = memref.load %arg1[%2] : memref<16xi32, #tpu.memory_space<smem>>
    %c0_i32_0 = arith.constant 0 : i32
    %c0_i32_1 = arith.constant 0 : i32
    %4 = tpu.memref_slice %arg2[%3, %c0_i32_1] : memref<64x128xf32, #tpu.memory_space<any>> -> memref<1x128xf32, #tpu.memory_space<any>>
    %c0_i32_2 = arith.constant 0 : i32
    %c0_i32_3 = arith.constant 0 : i32
    %5 = tpu.memref_slice %arg4[%c0_i32_2, %c0_i32_3] : memref<8x128xf32, #tpu.memory_space<vmem>> -> memref<1x128xf32, #tpu.memory_space<vmem>>
    %6 = tpu.memref_slice %arg5[%c0_i32_0] : memref<8x!tpu.dma_semaphore, #tpu.memory_space<semaphore_mem>> -> memref<1x!tpu.dma_semaphore, #tpu.memory_space<semaphore_mem>>
    %7 = tpu.memref_squeeze %6 : memref<1x!tpu.dma_semaphore, #tpu.memory_space<semaphore_mem>> -> memref<!tpu.dma_semaphore, #tpu.memory_space<semaphore_mem>>
    tpu.enqueue_dma source(%4 : memref<1x128xf32, #tpu.memory_space<any>>) target(%5 : memref<1x128xf32, #tpu.memory_space<vmem>>) target_semaphore(%7 : memref<!tpu.dma_semaphore, #tpu.memory_space<semaphore_mem>>)
    %c1_i32 = arith.constant 1 : i32
    %8 = arith.addi %0, %c1_i32 : i32
    %9 = arith.index_cast %8 : i32 to index
    %10 = memref.load %arg1[%9] : memref<16xi32, #tpu.memory_space<smem>>
    %c1_i32_4 = arith.constant 1 : i32
    %c0_i32_5 = arith.constant 0 : i32
    %11 = tpu.memref_slice %arg2[%10, %c0_i32_5] : memref<64x128xf32, #tpu.memory_space<any>> -> memref<1x128xf32, #tpu.memory_space<any>>
    %c1_i32_6 = arith.constant 1 : i32
    %c0_i32_7 = arith.constant 0 : i32
    %12 = tpu.memref_slice %arg4[%c1_i32_6, %c0_i32_7] : memref<8x128xf32, #tpu.memory_space<vmem>> -> memref<1x128xf32, #tpu.memory_space<vmem>>
    %13 = tpu.memref_slice %arg5[%c1_i32_4] : memref<8x!tpu.dma_semaphore, #tpu.memory_space<semaphore_mem>> -> memref<1x!tpu.dma_semaphore, #tpu.memory_space<semaphore_mem>>
    %14 = tpu.memref_squeeze %13 : memref<1x!tpu.dma_semaphore, #tpu.memory_space<semaphore_mem>> -> memref<!tpu.dma_semaphore, #tpu.memory_space<semaphore_mem>>
    tpu.enqueue_dma source(%11 : memref<1x128xf32, #tpu.memory_space<any>>) target(%12 : memref<1x128xf32, #tpu.memory_space<vmem>>) target_semaphore(%14 : memref<!tpu.dma_semaphore, #tpu.memory_space<semaphore_mem>>)
    %c2_i32 = arith.constant 2 : i32
    %15 = arith.addi %0, %c2_i32 : i32
    %16 = arith.index_cast %15 : i32 to index
    %17 = memref.load %arg1[%16] : memref<16xi32, #tpu.memory_space<smem>>
    %c2_i32_8 = arith.constant 2 : i32
    %c0_i32_9 = arith.constant 0 : i32
    %18 = tpu.memref_slice %arg2[%17, %c0_i32_9] : memref<64x128xf32, #tpu.memory_space<any>> -> memref<1x128xf32, #tpu.memory_space<any>>
    %c2_i32_10 = arith.constant 2 : i32
    %c0_i32_11 = arith.constant 0 : i32
    %19 = tpu.memref_slice %arg4[%c2_i32_10, %c0_i32_11] : memref<8x128xf32, #tpu.memory_space<vmem>> -> memref<1x128xf32, #tpu.memory_space<vmem>>
    %20 = tpu.memref_slice %arg5[%c2_i32_8] : memref<8x!tpu.dma_semaphore, #tpu.memory_space<semaphore_mem>> -> memref<1x!tpu.dma_semaphore, #tpu.memory_space<semaphore_mem>>
    %21 = tpu.memref_squeeze %20 : memref<1x!tpu.dma_semaphore, #tpu.memory_space<semaphore_mem>> -> memref<!tpu.dma_semaphore, #tpu.memory_space<semaphore_mem>>
    tpu.enqueue_dma source(%18 : memref<1x128xf32, #tpu.memory_space<any>>) target(%19 : memref<1x128xf32, #tpu.memory_space<vmem>>) target_semaphore(%21 : memref<!tpu.dma_semaphore, #tpu.memory_space<semaphore_mem>>)
    %c3_i32 = arith.constant 3 : i32
    %22 = arith.addi %0, %c3_i32 : i32
    %23 = arith.index_cast %22 : i32 to index
    %24 = memref.load %arg1[%23] : memref<16xi32, #tpu.memory_space<smem>>
    %c3_i32_12 = arith.constant 3 : i32
    %c0_i32_13 = arith.constant 0 : i32
    %25 = tpu.memref_slice %arg2[%24, %c0_i32_13] : memref<64x128xf32, #tpu.memory_space<any>> -> memref<1x128xf32, #tpu.memory_space<any>>
    %c3_i32_14 = arith.constant 3 : i32
    %c0_i32_15 = arith.constant 0 : i32
    %26 = tpu.memref_slice %arg4[%c3_i32_14, %c0_i32_15] : memref<8x128xf32, #tpu.memory_space<vmem>> -> memref<1x128xf32, #tpu.memory_space<vmem>>
    %27 = tpu.memref_slice %arg5[%c3_i32_12] : memref<8x!tpu.dma_semaphore, #tpu.memory_space<semaphore_mem>> -> memref<1x!tpu.dma_semaphore, #tpu.memory_space<semaphore_mem>>
    %28 = tpu.memref_squeeze %27 : memref<1x!tpu.dma_semaphore, #tpu.memory_space<semaphore_mem>> -> memref<!tpu.dma_semaphore, #tpu.memory_space<semaphore_mem>>
    tpu.enqueue_dma source(%25 : memref<1x128xf32, #tpu.memory_space<any>>) target(%26 : memref<1x128xf32, #tpu.memory_space<vmem>>) target_semaphore(%28 : memref<!tpu.dma_semaphore, #tpu.memory_space<semaphore_mem>>)
    %c4_i32 = arith.constant 4 : i32
    %29 = arith.addi %0, %c4_i32 : i32
    %30 = arith.index_cast %29 : i32 to index
    %31 = memref.load %arg1[%30] : memref<16xi32, #tpu.memory_space<smem>>
    %c4_i32_16 = arith.constant 4 : i32
    %c0_i32_17 = arith.constant 0 : i32
    %32 = tpu.memref_slice %arg2[%31, %c0_i32_17] : memref<64x128xf32, #tpu.memory_space<any>> -> memref<1x128xf32, #tpu.memory_space<any>>
    %c4_i32_18 = arith.constant 4 : i32
    %c0_i32_19 = arith.constant 0 : i32
    %33 = tpu.memref_slice %arg4[%c4_i32_18, %c0_i32_19] : memref<8x128xf32, #tpu.memory_space<vmem>> -> memref<1x128xf32, #tpu.memory_space<vmem>>
    %34 = tpu.memref_slice %arg5[%c4_i32_16] : memref<8x!tpu.dma_semaphore, #tpu.memory_space<semaphore_mem>> -> memref<1x!tpu.dma_semaphore, #tpu.memory_space<semaphore_mem>>
    %35 = tpu.memref_squeeze %34 : memref<1x!tpu.dma_semaphore, #tpu.memory_space<semaphore_mem>> -> memref<!tpu.dma_semaphore, #tpu.memory_space<semaphore_mem>>
    tpu.enqueue_dma source(%32 : memref<1x128xf32, #tpu.memory_space<any>>) target(%33 : memref<1x128xf32, #tpu.memory_space<vmem>>) target_semaphore(%35 : memref<!tpu.dma_semaphore, #tpu.memory_space<semaphore_mem>>)
    %c5_i32 = arith.constant 5 : i32
    %36 = arith.addi %0, %c5_i32 : i32
    %37 = arith.index_cast %36 : i32 to index
    %38 = memref.load %arg1[%37] : memref<16xi32, #tpu.memory_space<smem>>
    %c5_i32_20 = arith.constant 5 : i32
    %c0_i32_21 = arith.constant 0 : i32
    %39 = tpu.memref_slice %arg2[%38, %c0_i32_21] : memref<64x128xf32, #tpu.memory_space<any>> -> memref<1x128xf32, #tpu.memory_space<any>>
    %c5_i32_22 = arith.constant 5 : i32
    %c0_i32_23 = arith.constant 0 : i32
    %40 = tpu.memref_slice %arg4[%c5_i32_22, %c0_i32_23] : memref<8x128xf32, #tpu.memory_space<vmem>> -> memref<1x128xf32, #tpu.memory_space<vmem>>
    %41 = tpu.memref_slice %arg5[%c5_i32_20] : memref<8x!tpu.dma_semaphore, #tpu.memory_space<semaphore_mem>> -> memref<1x!tpu.dma_semaphore, #tpu.memory_space<semaphore_mem>>
    %42 = tpu.memref_squeeze %41 : memref<1x!tpu.dma_semaphore, #tpu.memory_space<semaphore_mem>> -> memref<!tpu.dma_semaphore, #tpu.memory_space<semaphore_mem>>
    tpu.enqueue_dma source(%39 : memref<1x128xf32, #tpu.memory_space<any>>) target(%40 : memref<1x128xf32, #tpu.memory_space<vmem>>) target_semaphore(%42 : memref<!tpu.dma_semaphore, #tpu.memory_space<semaphore_mem>>)
    %c6_i32 = arith.constant 6 : i32
    %43 = arith.addi %0, %c6_i32 : i32
    %44 = arith.index_cast %43 : i32 to index
    %45 = memref.load %arg1[%44] : memref<16xi32, #tpu.memory_space<smem>>
    %c6_i32_24 = arith.constant 6 : i32
    %c0_i32_25 = arith.constant 0 : i32
    %46 = tpu.memref_slice %arg2[%45, %c0_i32_25] : memref<64x128xf32, #tpu.memory_space<any>> -> memref<1x128xf32, #tpu.memory_space<any>>
    %c6_i32_26 = arith.constant 6 : i32
    %c0_i32_27 = arith.constant 0 : i32
    %47 = tpu.memref_slice %arg4[%c6_i32_26, %c0_i32_27] : memref<8x128xf32, #tpu.memory_space<vmem>> -> memref<1x128xf32, #tpu.memory_space<vmem>>
    %48 = tpu.memref_slice %arg5[%c6_i32_24] : memref<8x!tpu.dma_semaphore, #tpu.memory_space<semaphore_mem>> -> memref<1x!tpu.dma_semaphore, #tpu.memory_space<semaphore_mem>>
    %49 = tpu.memref_squeeze %48 : memref<1x!tpu.dma_semaphore, #tpu.memory_space<semaphore_mem>> -> memref<!tpu.dma_semaphore, #tpu.memory_space<semaphore_mem>>
    tpu.enqueue_dma source(%46 : memref<1x128xf32, #tpu.memory_space<any>>) target(%47 : memref<1x128xf32, #tpu.memory_space<vmem>>) target_semaphore(%49 : memref<!tpu.dma_semaphore, #tpu.memory_space<semaphore_mem>>)
    %c7_i32 = arith.constant 7 : i32
    %50 = arith.addi %0, %c7_i32 : i32
    %51 = arith.index_cast %50 : i32 to index
    %52 = memref.load %arg1[%51] : memref<16xi32, #tpu.memory_space<smem>>
    %c7_i32_28 = arith.constant 7 : i32
    %c0_i32_29 = arith.constant 0 : i32
    %53 = tpu.memref_slice %arg2[%52, %c0_i32_29] : memref<64x128xf32, #tpu.memory_space<any>> -> memref<1x128xf32, #tpu.memory_space<any>>
    %c7_i32_30 = arith.constant 7 : i32
    %c0_i32_31 = arith.constant 0 : i32
    %54 = tpu.memref_slice %arg4[%c7_i32_30, %c0_i32_31] : memref<8x128xf32, #tpu.memory_space<vmem>> -> memref<1x128xf32, #tpu.memory_space<vmem>>
    %55 = tpu.memref_slice %arg5[%c7_i32_28] : memref<8x!tpu.dma_semaphore, #tpu.memory_space<semaphore_mem>> -> memref<1x!tpu.dma_semaphore, #tpu.memory_space<semaphore_mem>>
    %56 = tpu.memref_squeeze %55 : memref<1x!tpu.dma_semaphore, #tpu.memory_space<semaphore_mem>> -> memref<!tpu.dma_semaphore, #tpu.memory_space<semaphore_mem>>
    tpu.enqueue_dma source(%53 : memref<1x128xf32, #tpu.memory_space<any>>) target(%54 : memref<1x128xf32, #tpu.memory_space<vmem>>) target_semaphore(%56 : memref<!tpu.dma_semaphore, #tpu.memory_space<semaphore_mem>>)
    %c0_i32_32 = arith.constant 0 : i32
    %c0_i32_33 = arith.constant 0 : i32
    %57 = tpu.memref_slice %arg2[%3, %c0_i32_33] : memref<64x128xf32, #tpu.memory_space<any>> -> memref<1x128xf32, #tpu.memory_space<any>>
    %c0_i32_34 = arith.constant 0 : i32
    %c0_i32_35 = arith.constant 0 : i32
    %58 = tpu.memref_slice %arg4[%c0_i32_34, %c0_i32_35] : memref<8x128xf32, #tpu.memory_space<vmem>> -> memref<1x128xf32, #tpu.memory_space<vmem>>
    %59 = tpu.memref_slice %arg5[%c0_i32_32] : memref<8x!tpu.dma_semaphore, #tpu.memory_space<semaphore_mem>> -> memref<1x!tpu.dma_semaphore, #tpu.memory_space<semaphore_mem>>
    %60 = tpu.memref_squeeze %59 : memref<1x!tpu.dma_semaphore, #tpu.memory_space<semaphore_mem>> -> memref<!tpu.dma_semaphore, #tpu.memory_space<semaphore_mem>>
    tpu.wait_dma2 semaphore(%60 : memref<!tpu.dma_semaphore, #tpu.memory_space<semaphore_mem>>) src(%57 : memref<1x128xf32, #tpu.memory_space<any>>) dst(%58 : memref<1x128xf32, #tpu.memory_space<vmem>>)
    %c1_i32_36 = arith.constant 1 : i32
    %c0_i32_37 = arith.constant 0 : i32
    %61 = tpu.memref_slice %arg2[%10, %c0_i32_37] : memref<64x128xf32, #tpu.memory_space<any>> -> memref<1x128xf32, #tpu.memory_space<any>>
    %c1_i32_38 = arith.constant 1 : i32
    %c0_i32_39 = arith.constant 0 : i32
    %62 = tpu.memref_slice %arg4[%c1_i32_38, %c0_i32_39] : memref<8x128xf32, #tpu.memory_space<vmem>> -> memref<1x128xf32, #tpu.memory_space<vmem>>
    %63 = tpu.memref_slice %arg5[%c1_i32_36] : memref<8x!tpu.dma_semaphore, #tpu.memory_space<semaphore_mem>> -> memref<1x!tpu.dma_semaphore, #tpu.memory_space<semaphore_mem>>
    %64 = tpu.memref_squeeze %63 : memref<1x!tpu.dma_semaphore, #tpu.memory_space<semaphore_mem>> -> memref<!tpu.dma_semaphore, #tpu.memory_space<semaphore_mem>>
    tpu.wait_dma2 semaphore(%64 : memref<!tpu.dma_semaphore, #tpu.memory_space<semaphore_mem>>) src(%61 : memref<1x128xf32, #tpu.memory_space<any>>) dst(%62 : memref<1x128xf32, #tpu.memory_space<vmem>>)
    %c2_i32_40 = arith.constant 2 : i32
    %c0_i32_41 = arith.constant 0 : i32
    %65 = tpu.memref_slice %arg2[%17, %c0_i32_41] : memref<64x128xf32, #tpu.memory_space<any>> -> memref<1x128xf32, #tpu.memory_space<any>>
    %c2_i32_42 = arith.constant 2 : i32
    %c0_i32_43 = arith.constant 0 : i32
    %66 = tpu.memref_slice %arg4[%c2_i32_42, %c0_i32_43] : memref<8x128xf32, #tpu.memory_space<vmem>> -> memref<1x128xf32, #tpu.memory_space<vmem>>
    %67 = tpu.memref_slice %arg5[%c2_i32_40] : memref<8x!tpu.dma_semaphore, #tpu.memory_space<semaphore_mem>> -> memref<1x!tpu.dma_semaphore, #tpu.memory_space<semaphore_mem>>
    %68 = tpu.memref_squeeze %67 : memref<1x!tpu.dma_semaphore, #tpu.memory_space<semaphore_mem>> -> memref<!tpu.dma_semaphore, #tpu.memory_space<semaphore_mem>>
    tpu.wait_dma2 semaphore(%68 : memref<!tpu.dma_semaphore, #tpu.memory_space<semaphore_mem>>) src(%65 : memref<1x128xf32, #tpu.memory_space<any>>) dst(%66 : memref<1x128xf32, #tpu.memory_space<vmem>>)
    %c3_i32_44 = arith.constant 3 : i32
    %c0_i32_45 = arith.constant 0 : i32
    %69 = tpu.memref_slice %arg2[%24, %c0_i32_45] : memref<64x128xf32, #tpu.memory_space<any>> -> memref<1x128xf32, #tpu.memory_space<any>>
    %c3_i32_46 = arith.constant 3 : i32
    %c0_i32_47 = arith.constant 0 : i32
    %70 = tpu.memref_slice %arg4[%c3_i32_46, %c0_i32_47] : memref<8x128xf32, #tpu.memory_space<vmem>> -> memref<1x128xf32, #tpu.memory_space<vmem>>
    %71 = tpu.memref_slice %arg5[%c3_i32_44] : memref<8x!tpu.dma_semaphore, #tpu.memory_space<semaphore_mem>> -> memref<1x!tpu.dma_semaphore, #tpu.memory_space<semaphore_mem>>
    %72 = tpu.memref_squeeze %71 : memref<1x!tpu.dma_semaphore, #tpu.memory_space<semaphore_mem>> -> memref<!tpu.dma_semaphore, #tpu.memory_space<semaphore_mem>>
    tpu.wait_dma2 semaphore(%72 : memref<!tpu.dma_semaphore, #tpu.memory_space<semaphore_mem>>) src(%69 : memref<1x128xf32, #tpu.memory_space<any>>) dst(%70 : memref<1x128xf32, #tpu.memory_space<vmem>>)
    %c4_i32_48 = arith.constant 4 : i32
    %c0_i32_49 = arith.constant 0 : i32
    %73 = tpu.memref_slice %arg2[%31, %c0_i32_49] : memref<64x128xf32, #tpu.memory_space<any>> -> memref<1x128xf32, #tpu.memory_space<any>>
    %c4_i32_50 = arith.constant 4 : i32
    %c0_i32_51 = arith.constant 0 : i32
    %74 = tpu.memref_slice %arg4[%c4_i32_50, %c0_i32_51] : memref<8x128xf32, #tpu.memory_space<vmem>> -> memref<1x128xf32, #tpu.memory_space<vmem>>
    %75 = tpu.memref_slice %arg5[%c4_i32_48] : memref<8x!tpu.dma_semaphore, #tpu.memory_space<semaphore_mem>> -> memref<1x!tpu.dma_semaphore, #tpu.memory_space<semaphore_mem>>
    %76 = tpu.memref_squeeze %75 : memref<1x!tpu.dma_semaphore, #tpu.memory_space<semaphore_mem>> -> memref<!tpu.dma_semaphore, #tpu.memory_space<semaphore_mem>>
    tpu.wait_dma2 semaphore(%76 : memref<!tpu.dma_semaphore, #tpu.memory_space<semaphore_mem>>) src(%73 : memref<1x128xf32, #tpu.memory_space<any>>) dst(%74 : memref<1x128xf32, #tpu.memory_space<vmem>>)
    %c5_i32_52 = arith.constant 5 : i32
    %c0_i32_53 = arith.constant 0 : i32
    %77 = tpu.memref_slice %arg2[%38, %c0_i32_53] : memref<64x128xf32, #tpu.memory_space<any>> -> memref<1x128xf32, #tpu.memory_space<any>>
    %c5_i32_54 = arith.constant 5 : i32
    %c0_i32_55 = arith.constant 0 : i32
    %78 = tpu.memref_slice %arg4[%c5_i32_54, %c0_i32_55] : memref<8x128xf32, #tpu.memory_space<vmem>> -> memref<1x128xf32, #tpu.memory_space<vmem>>
    %79 = tpu.memref_slice %arg5[%c5_i32_52] : memref<8x!tpu.dma_semaphore, #tpu.memory_space<semaphore_mem>> -> memref<1x!tpu.dma_semaphore, #tpu.memory_space<semaphore_mem>>
    %80 = tpu.memref_squeeze %79 : memref<1x!tpu.dma_semaphore, #tpu.memory_space<semaphore_mem>> -> memref<!tpu.dma_semaphore, #tpu.memory_space<semaphore_mem>>
    tpu.wait_dma2 semaphore(%80 : memref<!tpu.dma_semaphore, #tpu.memory_space<semaphore_mem>>) src(%77 : memref<1x128xf32, #tpu.memory_space<any>>) dst(%78 : memref<1x128xf32, #tpu.memory_space<vmem>>)
    %c6_i32_56 = arith.constant 6 : i32
    %c0_i32_57 = arith.constant 0 : i32
    %81 = tpu.memref_slice %arg2[%45, %c0_i32_57] : memref<64x128xf32, #tpu.memory_space<any>> -> memref<1x128xf32, #tpu.memory_space<any>>
    %c6_i32_58 = arith.constant 6 : i32
    %c0_i32_59 = arith.constant 0 : i32
    %82 = tpu.memref_slice %arg4[%c6_i32_58, %c0_i32_59] : memref<8x128xf32, #tpu.memory_space<vmem>> -> memref<1x128xf32, #tpu.memory_space<vmem>>
    %83 = tpu.memref_slice %arg5[%c6_i32_56] : memref<8x!tpu.dma_semaphore, #tpu.memory_space<semaphore_mem>> -> memref<1x!tpu.dma_semaphore, #tpu.memory_space<semaphore_mem>>
    %84 = tpu.memref_squeeze %83 : memref<1x!tpu.dma_semaphore, #tpu.memory_space<semaphore_mem>> -> memref<!tpu.dma_semaphore, #tpu.memory_space<semaphore_mem>>
    tpu.wait_dma2 semaphore(%84 : memref<!tpu.dma_semaphore, #tpu.memory_space<semaphore_mem>>) src(%81 : memref<1x128xf32, #tpu.memory_space<any>>) dst(%82 : memref<1x128xf32, #tpu.memory_space<vmem>>)
    %c7_i32_60 = arith.constant 7 : i32
    %c0_i32_61 = arith.constant 0 : i32
    %85 = tpu.memref_slice %arg2[%52, %c0_i32_61] : memref<64x128xf32, #tpu.memory_space<any>> -> memref<1x128xf32, #tpu.memory_space<any>>
    %c7_i32_62 = arith.constant 7 : i32
    %c0_i32_63 = arith.constant 0 : i32
    %86 = tpu.memref_slice %arg4[%c7_i32_62, %c0_i32_63] : memref<8x128xf32, #tpu.memory_space<vmem>> -> memref<1x128xf32, #tpu.memory_space<vmem>>
    %87 = tpu.memref_slice %arg5[%c7_i32_60] : memref<8x!tpu.dma_semaphore, #tpu.memory_space<semaphore_mem>> -> memref<1x!tpu.dma_semaphore, #tpu.memory_space<semaphore_mem>>
    %88 = tpu.memref_squeeze %87 : memref<1x!tpu.dma_semaphore, #tpu.memory_space<semaphore_mem>> -> memref<!tpu.dma_semaphore, #tpu.memory_space<semaphore_mem>>
    tpu.wait_dma2 semaphore(%88 : memref<!tpu.dma_semaphore, #tpu.memory_space<semaphore_mem>>) src(%85 : memref<1x128xf32, #tpu.memory_space<any>>) dst(%86 : memref<1x128xf32, #tpu.memory_space<vmem>>)
    %cst = arith.constant 1.280000e+02 : f32
    %89 = math.sqrt %cst : f32
    %c0 = arith.constant 0 : index
    %c0_64 = arith.constant 0 : index
    %90 = vector.load %arg4[%c0, %c0_64] : memref<8x128xf32, #tpu.memory_space<vmem>>, vector<8x128xf32>
    %91 = vector.broadcast %89 : f32 to vector<8x128xf32>
    %92 = arith.mulf %90, %91 : vector<8x128xf32>
    %c0_65 = arith.constant 0 : index
    %c0_66 = arith.constant 0 : index
    %93 = vector.load %arg3[%c0_65, %c0_66] : memref<8x128xf32, #tpu.memory_space<vmem>>, vector<8x128xf32>
    tpu.vector_store %arg3[%c0_65, %c0_66], %92 {strides = array<i32>} : memref<8x128xf32, #tpu.memory_space<vmem>>, vector<8x128xf32>,
    return
  }
  func.func @transform_1(%arg0: i32, %arg1: memref<16xi32, #tpu.memory_space<smem>>) -> (i32, i32) {
    %c0_i32 = arith.constant 0 : i32
    %c0_i32_0 = arith.constant 0 : i32
    return %arg0, %c0_i32 : i32, i32
  }
}

</mosaic_0001>

<bundles_post_ra>
// kernel: tpu_custom_call.1
= control target key start
LH: loop header
LB: loop body
LE: loop exit
PB: predicated region body
PF: predicated region fallthrough
CT: control target
= control target key end

     0   :  { %s655_s9 = smov [#allocation5]   ;;  %s882_s0 = inlined_call_operand.hbm [shape: s32[16], index: 0, kind: input, shape index: {}]   ;;  %s883_s1 = inlined_call_operand.hbm [shape: f32[64,128], index: 1, kind: input, shape index: {}]   ;;  %s884_s2 = inlined_call_operand.hbm [shape: f32[16,128], index: 2, kind: output, shape index: {}]  }
   0x1   :  { %8 = dma.hbm_to_smem %s882_s0, 16, %s655_s9, [#allocation4] }
   0x2   :  { %621 = dma.done.wait [#allocation4], 16 }
   0x3   :  { %622 = vsyncadd [#allocation4], 4294967280 }
   0x4   :  { %10 = sfence }
   0x5   :  { %11 = vsyncpa [#allocation7], 0 }
   0x6   :  { %13 = vsyncpa [#allocation7 + $0x1], 0  ;;  %s683_s12 = smov 0   ;;  %s685_s13 = smov 0  }
   0x7   :  { %s687_s14 = smov 0  }
   0x8 LB: > { %s334_s0 = sadd.s32 4294967295, %s653_s14   ;;  %s700_s15 = sadd.s32 1, %s653_s14   ;;  %s653_s14 = sphi %s687_s14, %s889_s14   ;;  %s649_s13 = sphi %s685_s13, %s888_s13   ;;  %s645_s12 = sphi %s683_s12, %s887_s12  }
   0x9   : > { %s22_s16 = ssub.s32 %s653_s14, %s700_s15  ;;  %s25_s17 = sadd.s32 1, %s649_s13 }
   0xa   : > { %p23_p0 = scmp.eq.s32.totalorder %s22_s16, 0  ;;  %p335_p1 = scmp.ne.s32.totalorder %s22_s16, 0 }
   0xb   : > { %p29_p2 = scmp.eq.s32.totalorder %s653_s14, 1  ;;  %p34_p3 = scmp.ne.s32.totalorder %s649_s13, %s645_s12 }
   0xc   : > { %s709_s18 = scalar_select %p23_p0, %s649_s13, %s25_s17  }
   0xd   : > { %p711_p4 = por %p335_p1, %p29_p2  ;;  %p35_p5 = scmp.eq.s32.totalorder %s334_s0, 1 }
   0xe   : > { %p336_p7 = scmp.ge.s32.totalorder %s653_s14, 2 }
   0xf   : > { %p715_p6 = por %p35_p5, %p34_p3  ;;  %s49_s21 = sand.u32 (!%p336_p7), 1, %s649_s13  }
  0x10   : > { %44 = sbr.rel (%p336_p7) target bundleno = 220 (0xdc), region = 12  ;;  %s722_s22 = sshll.u32 (!%p336_p7), %s653_s14, 3 }
  0x11   : > { %s726_s23 = sshll.u32 (!%p336_p7), %s49_s21, 3  ;;  %s53_s24 = sld [smem:[#allocation5 + %s722_s22]] (!%p336_p7) }
  0x12   : > { %s656_s25 = smov (!%p336_p7), [#allocation2]   ;;  %s67_s27 = sadd.s32 (!%p336_p7), 1, %s722_s22 }
  0x13   : > { %s63_s26 = sshll.u32 (!%p336_p7), %s656_s25, 4  ;;  %s732_s28 = sld [smem:[#allocation5 + %s67_s27]] (!%p336_p7)  ;;  %s730_s26 = int_to_ptr.vmem [resolvable:$true] %s63_s26 }
  0x14   : > { %s84_s29 = sadd.s32 (!%p336_p7), 2, %s722_s22  ;;  %s657_s30 = smov (!%p336_p7), [#allocation2 + $0x1]  }
  0x15   : > { %s80_s3 = sshll.u32 %s657_s30, 4  ;;  %s735_s4 = sld [smem:[#allocation5 + %s84_s29]]  ;;  %s737_s3 = int_to_ptr.vmem [resolvable:$true] %s80_s3 }
  0x16   : > { %s745_s0 = scalar_lea.hbm %s883_s1, 1024 }
  0x17   : > { %s339_s5 = sshll.u32 %s53_s24, 4 }
  0x18   : > { %s55_s8 = scalar_lea.hbm %s883_s1, %s339_s5 }
  0x19   : > { %s407_s9 = scalar_lea.hbm %s55_s8, 16  ;;  %p410_p9 = scmp.lt.s32.totalorder %s55_s8, %s883_s1 }
  0x1a   : > { %p408_p8 = scmp.ne.s32.totalorder %s55_s8, %s407_s9  ;;  %p411_p10 = scmp.lt.s32.totalorder %s745_s0, %s407_s9 }
  0x1c   : > { %p412_p11 = por %p411_p10, %p410_p9 }
  0x1e   : > { %p413_p12 = pnand %p412_p11, %p408_p8 }
  0x20   : > { %416 = shalt.err (!%p413_p12)  }
  0x21   : > { %s417_s24 = scalar_lea.vmem %s730_s26, 16  ;;  %s754_s25 = scalar_lea.vmem %s730_s26, 128 }
  0x22   : > { %p418_p13 = scmp.ne.s32.totalorder %s730_s26, %s417_s24  ;;  %p422_p0 = scmp.lt.s32.totalorder %s730_s26, %s730_s26 }
  0x23   : > { %p423_p1 = scmp.lt.s32.totalorder %s754_s25, %s417_s24 }
  0x25   : > { %p424_p2 = por %p423_p1, %p422_p0 }
  0x27   : > { %p425_p3 = pnand %p424_p2, %p418_p13 }
  0x29   : > { %428 = shalt.err (!%p425_p3)  }
  0x2a   : > { %66 = dma.hbm_to_vmem [thread:$0]  %s55_s8, 16, %s730_s26, [#allocation3] }
  0x2b   : > { %s340_s27 = sshll.u32 %s732_s28, 4  ;;  %s658_s29 = smov [#allocation2 + $0x2]  }
  0x2c   : > { %s97_s30 = sshll.u32 %s658_s29, 4  ;;  %s70_s7 = scalar_lea.hbm %s883_s1, %s340_s27  ;;  %s764_s30 = int_to_ptr.vmem [resolvable:$true] %s97_s30 }
  0x2d   : > { %s429_s9 = scalar_lea.hbm %s70_s7, 16  ;;  %p432_p7 = scmp.lt.s32.totalorder %s70_s7, %s883_s1 }
  0x2e   : > { %p430_p5 = scmp.ne.s32.totalorder %s70_s7, %s429_s9  ;;  %p433_p8 = scmp.lt.s32.totalorder %s745_s0, %s429_s9 }
  0x30   : > { %p434_p9 = por %p433_p8, %p432_p7 }
  0x32   : > { %p435_p10 = pnand %p434_p9, %p430_p5 }
  0x34   : > { %438 = shalt.err (!%p435_p10)  }
  0x35   : > { %s439_s28 = scalar_lea.vmem %s737_s3, 16  ;;  %p444_p12 = scmp.lt.s32.totalorder %s737_s3, %s730_s26 }
  0x36   : > { %p440_p11 = scmp.ne.s32.totalorder %s737_s3, %s439_s28  ;;  %p445_p13 = scmp.lt.s32.totalorder %s754_s25, %s439_s28 }
  0x38   : > { %p446_p0 = por %p445_p13, %p444_p12 }
  0x3a   : > { %p447_p1 = pnand %p446_p0, %p440_p11 }
  0x3c   : > { %450 = shalt.err (!%p447_p1)  }
  0x3d   : > { %83 = dma.hbm_to_vmem [thread:$0]  %s70_s7, 16, %s737_s3, [#allocation3 + $0x1] }
  0x3e   : > { %s341_s8 = sshll.u32 %s735_s4, 4  ;;  %s101_s16 = sadd.s32 3, %s722_s22 }
  0x3f   : > { %s87_s27 = scalar_lea.hbm %s883_s1, %s341_s8  ;;  %s102_s29 = sld [smem:[#allocation5 + %s101_s16]] }
  0x40   : > { %s451_s5 = scalar_lea.hbm %s87_s27, 16  ;;  %p454_p3 = scmp.lt.s32.totalorder %s87_s27, %s883_s1 }
  0x41   : > { %p452_p2 = scmp.ne.s32.totalorder %s87_s27, %s451_s5  ;;  %p455_p5 = scmp.lt.s32.totalorder %s745_s0, %s451_s5 }
  0x43   : > { %p456_p7 = por %p455_p5, %p454_p3 }
  0x45   : > { %p457_p8 = pnand %p456_p7, %p452_p2 }
  0x47   : > { %460 = shalt.err (!%p457_p8)  }
  0x48   : > { %s461_s3 = scalar_lea.vmem %s764_s30, 16  ;;  %p466_p10 = scmp.lt.s32.totalorder %s764_s30, %s730_s26 }
  0x49   : > { %p462_p9 = scmp.ne.s32.totalorder %s764_s30, %s461_s3  ;;  %p467_p11 = scmp.lt.s32.totalorder %s754_s25, %s461_s3 }
  0x4b   : > { %p468_p12 = por %p467_p11, %p466_p10 }
  0x4d   : > { %p469_p13 = pnand %p468_p12, %p462_p9 }
  0x4f   : > { %472 = shalt.err (!%p469_p13)  }
  0x50   : > { %100 = dma.hbm_to_vmem [thread:$0]  %s87_s27, 16, %s764_s30, [#allocation3 + $0x2] }
  0x51   : > { %s118_s4 = sadd.s32 4, %s722_s22  ;;  %s659_s7 = smov [#allocation2 + $0x3]  }
  0x52   : > { %s114_s10 = sshll.u32 %s659_s7, 4  ;;  %s119_s11 = sld [smem:[#allocation5 + %s118_s4]]  ;;  %s115_s10 = int_to_ptr.vmem [resolvable:$true] %s114_s10 }
  0x53   : > { %s660_s28 = smov [#allocation2 + $0x4]   ;;  %s135_s16 = sadd.s32 5, %s722_s22 }
  0x54   : > { %s131_s8 = sshll.u32 %s660_s28, 4  ;;  %s342_s17 = sshll.u32 %s102_s29, 4  ;;  %s793_s8 = int_to_ptr.vmem [resolvable:$true] %s131_s8 }
  0x55   : > { %s104_s6 = scalar_lea.hbm %s883_s1, %s342_s17  ;;  %s798_s9 = sld [smem:[#allocation5 + %s135_s16]] }
  0x56   : > { %s473_s3 = scalar_lea.hbm %s104_s6, 16  ;;  %p476_p1 = scmp.lt.s32.totalorder %s104_s6, %s883_s1 }
  0x57   : > { %p474_p0 = scmp.ne.s32.totalorder %s104_s6, %s473_s3  ;;  %p477_p2 = scmp.lt.s32.totalorder %s745_s0, %s473_s3 }
  0x59   : > { %p478_p3 = por %p477_p2, %p476_p1 }
  0x5b   : > { %p479_p5 = pnand %p478_p3, %p474_p0 }
  0x5d   : > { %482 = shalt.err (!%p479_p5)  }
  0x5e   : > { %s483_s4 = scalar_lea.vmem %s115_s10, 16  ;;  %p488_p8 = scmp.lt.s32.totalorder %s115_s10, %s730_s26 }
  0x5f   : > { %p484_p7 = scmp.ne.s32.totalorder %s115_s10, %s483_s4  ;;  %p489_p9 = scmp.lt.s32.totalorder %s754_s25, %s483_s4 }
  0x61   : > { %p490_p10 = por %p489_p9, %p488_p8 }
  0x63   : > { %p491_p11 = pnand %p490_p10, %p484_p7 }
  0x65   : > { %494 = shalt.err (!%p491_p11)  }
  0x66   : > { %117 = dma.hbm_to_vmem [thread:$0]  %s104_s6, 16, %s115_s10, [#allocation3 + $0x3] }
  0x67   : > { %s343_s29 = sshll.u32 %s119_s11, 4  ;;  %s661_s17 = smov [#allocation2 + $0x5]  }
  0x68   : > { %s121_s16 = scalar_lea.hbm %s883_s1, %s343_s29  ;;  %s148_s24 = sshll.u32 %s661_s17, 4  ;;  %s149_s24 = int_to_ptr.vmem [resolvable:$true] %s148_s24 }
  0x69   : > { %s495_s5 = scalar_lea.hbm %s121_s16, 16  ;;  %p498_p13 = scmp.lt.s32.totalorder %s121_s16, %s883_s1 }
  0x6a   : > { %p496_p12 = scmp.ne.s32.totalorder %s121_s16, %s495_s5  ;;  %p499_p0 = scmp.lt.s32.totalorder %s745_s0, %s495_s5 }
  0x6c   : > { %p500_p1 = por %p499_p0, %p498_p13 }
  0x6e   : > { %p501_p2 = pnand %p500_p1, %p496_p12 }
  0x70   : > { %504 = shalt.err (!%p501_p2)  }
  0x71   : > { %s505_s10 = scalar_lea.vmem %s793_s8, 16  ;;  %p510_p5 = scmp.lt.s32.totalorder %s793_s8, %s730_s26 }
  0x72   : > { %p506_p3 = scmp.ne.s32.totalorder %s793_s8, %s505_s10  ;;  %p511_p7 = scmp.lt.s32.totalorder %s754_s25, %s505_s10 }
  0x74   : > { %p512_p8 = por %p511_p7, %p510_p5 }
  0x76   : > { %p513_p9 = pnand %p512_p8, %p506_p3 }
  0x78   : > { %516 = shalt.err (!%p513_p9)  }
  0x79   : > { %134 = dma.hbm_to_vmem [thread:$0]  %s121_s16, 16, %s793_s8, [#allocation3 + $0x4] }
  0x7a   : > { %s152_s11 = sadd.s32 6, %s722_s22  ;;  %s344_s6 = sshll.u32 %s798_s9, 4 }
  0x7b   : > { %s153_s27 = sld [smem:[#allocation5 + %s152_s11]]  ;;  %s138_s7 = scalar_lea.hbm %s883_s1, %s344_s6 }
  0x7c   : > { %s517_s28 = scalar_lea.hbm %s138_s7, 16  ;;  %p520_p11 = scmp.lt.s32.totalorder %s138_s7, %s883_s1 }
  0x7d   : > { %p518_p10 = scmp.ne.s32.totalorder %s138_s7, %s517_s28  ;;  %p521_p12 = scmp.lt.s32.totalorder %s745_s0, %s517_s28 }
  0x7f   : > { %p522_p13 = por %p521_p12, %p520_p11 }
  0x81   : > { %p523_p0 = pnand %p522_p13, %p518_p10 }
  0x83   : > { %526 = shalt.err (!%p523_p0)  }
  0x84   : > { %s527_s3 = scalar_lea.vmem %s149_s24, 16  ;;  %p532_p2 = scmp.lt.s32.totalorder %s149_s24, %s730_s26 }
  0x85   : > { %p528_p1 = scmp.ne.s32.totalorder %s149_s24, %s527_s3  ;;  %p533_p3 = scmp.lt.s32.totalorder %s754_s25, %s527_s3 }
  0x87   : > { %p534_p5 = por %p533_p3, %p532_p2 }
  0x89   : > { %p535_p7 = pnand %p534_p5, %p528_p1 }
  0x8b   : > { %538 = shalt.err (!%p535_p7)  }
  0x8c   : > { %151 = dma.hbm_to_vmem [thread:$0]  %s138_s7, 16, %s149_s24, [#allocation3 + $0x5] }
  0x8d   : > { %s662_s8 = smov [#allocation2 + $0x6]   ;;  %s169_s16 = sadd.s32 7, %s722_s22 }
  0x8e   : > { %s165_s9 = sshll.u32 %s662_s8, 4  ;;  %s170_s30 = sld [smem:[#allocation5 + %s169_s16]]  ;;  %s166_s9 = int_to_ptr.vmem [resolvable:$true] %s165_s9 }
  0x8f   : > { %s345_s10 = sshll.u32 %s153_s27, 4  ;;  %s663_s11 = smov [#allocation2 + $0x7]  }
  0x90   : > { %s182_s6 = sshll.u32 %s663_s11, 4  ;;  %s155_s28 = scalar_lea.hbm %s883_s1, %s345_s10  ;;  %s183_s6 = int_to_ptr.vmem [resolvable:$true] %s182_s6 }
  0x91   : > { %s539_s17 = scalar_lea.hbm %s155_s28, 16  ;;  %p542_p9 = scmp.lt.s32.totalorder %s155_s28, %s883_s1 }
  0x92   : > { %p540_p8 = scmp.ne.s32.totalorder %s155_s28, %s539_s17  ;;  %p543_p10 = scmp.lt.s32.totalorder %s745_s0, %s539_s17 }
  0x94   : > { %p544_p11 = por %p543_p10, %p542_p9 }
  0x96   : > { %p545_p12 = pnand %p544_p11, %p540_p8 }
  0x98   : > { %548 = shalt.err (!%p545_p12)  }
  0x99   : > { %s549_s22 = scalar_lea.vmem %s166_s9, 16  ;;  %p554_p0 = scmp.lt.s32.totalorder %s166_s9, %s730_s26 }
  0x9a   : > { %p550_p13 = scmp.ne.s32.totalorder %s166_s9, %s549_s22  ;;  %p555_p1 = scmp.lt.s32.totalorder %s754_s25, %s549_s22 }
  0x9c   : > { %p556_p2 = por %p555_p1, %p554_p0 }
  0x9e   : > { %p557_p3 = pnand %p556_p2, %p550_p13 }
  0xa0   : > { %560 = shalt.err (!%p557_p3)  }
  0xa1   : > { %168 = dma.hbm_to_vmem [thread:$0]  %s155_s28, 16, %s166_s9, [#allocation3 + $0x6] }
  0xa2   : > { %s346_s24 = sshll.u32 %s170_s30, 4 }
  0xa3   : > { %s172_s8 = scalar_lea.hbm %s883_s1, %s346_s24 }
  0xa4   : > { %s561_s16 = scalar_lea.hbm %s172_s8, 16  ;;  %p564_p7 = scmp.lt.s32.totalorder %s172_s8, %s883_s1 }
  0xa5   : > { %p562_p5 = scmp.ne.s32.totalorder %s172_s8, %s561_s16  ;;  %p565_p8 = scmp.lt.s32.totalorder %s745_s0, %s561_s16 }
  0xa7   : > { %p566_p9 = por %p565_p8, %p564_p7 }
  0xa9   : > { %p567_p10 = pnand %p566_p9, %p562_p5 }
  0xab   : > { %570 = shalt.err (!%p567_p10)  }
  0xac   : > { %s571_s4 = scalar_lea.vmem %s183_s6, 16  ;;  %p576_p12 = scmp.lt.s32.totalorder %s183_s6, %s730_s26 }
  0xad   : > { %p572_p11 = scmp.ne.s32.totalorder %s183_s6, %s571_s4  ;;  %p577_p13 = scmp.lt.s32.totalorder %s754_s25, %s571_s4 }
  0xaf   : > { %p578_p0 = por %p577_p13, %p576_p12 }
  0xb1   : > { %p579_p1 = pnand %p578_p0, %p572_p11 }
  0xb3   : > { %582 = shalt.err (!%p579_p1)  }
  0xb4   : > { %185 = dma.hbm_to_vmem [thread:$0]  %s172_s8, 16, %s183_s6, [#allocation3 + $0x7] }
  0xb5   : > { %s51_s9 = scalar_lea.vmem [#allocation6], %s726_s23 }
  0xb6   : > { %623 = dma.done.wait [#allocation3], 16 }
  0xb7   : > { %624 = vsyncadd [#allocation3], 4294967280 }
  0xb8   : > { %625 = dma.done.wait [#allocation3 + $0x1], 16 }
  0xb9   : > { %626 = vsyncadd [#allocation3 + $0x1], 4294967280 }
  0xba   : > { %627 = dma.done.wait [#allocation3 + $0x2], 16 }
  0xbb   : > { %628 = vsyncadd [#allocation3 + $0x2], 4294967280 }
  0xbc   : > { %629 = dma.done.wait [#allocation3 + $0x3], 16 }
  0xbd   : > { %630 = vsyncadd [#allocation3 + $0x3], 4294967280 }
  0xbe   : > { %631 = dma.done.wait [#allocation3 + $0x4], 16 }
  0xbf   : > { %632 = vsyncadd [#allocation3 + $0x4], 4294967280 }
  0xc0   : > { %633 = dma.done.wait [#allocation3 + $0x5], 16 }
  0xc1   : > { %634 = vsyncadd [#allocation3 + $0x5], 4294967280 }
  0xc2   : > { %635 = dma.done.wait [#allocation3 + $0x6], 16 }
  0xc3   : > { %636 = vsyncadd [#allocation3 + $0x6], 4294967280 }
  0xc4   : > { %637 = dma.done.wait [#allocation3 + $0x7], 16 }
  0xc5   : > { %638 = vsyncadd [#allocation3 + $0x7], 4294967280  ;;  %s348_s23 = sshll.u32 %s653_s14, 7  ;;  %s220_s26 = sshll.u32 %s51_s9, 4  ;;  %v203_v0 = vld [vmem:[#allocation2] sm:$0xff]  ;;  %s221_s26 = int_to_ptr.vmem [resolvable:$true] %s220_s26 }
  0xc6   : > { %v204_v1 = vmul.f32 11.313708, %v203_v0  ;;  %s218_s30 = scalar_lea.hbm %s884_s2, %s348_s23  ;;  %s207_s6 = scalar_lea.sflag [#allocation7], %s49_s21 }
  0xc7   : > { %s583_s29 = scalar_lea.vmem %s221_s26, 128  ;;  %s664_s28 = smov [#allocation6]  }
  0xc8   : > { %205 = vst [vmem:[%s51_s9] sm:$0xff] %v204_v1  ;;  %p584_p2 = scmp.ne.s32.totalorder %s221_s26, %s583_s29  ;;  %s587_s17 = sshll.u32 %s664_s28, 4  ;;  %s588_s17 = int_to_ptr.vmem [resolvable:$false] %s587_s17 }
  0xc9   : > { %s589_s5 = scalar_lea.vmem %s588_s17, 256  ;;  %p590_p7 = scmp.lt.s32.totalorder %s221_s26, %s588_s17 }
  0xca   : > { %p585_p3 = pnand %p584_p2, %p711_p4  ;;  %p591_p8 = scmp.lt.s32.totalorder %s589_s5, %s583_s29 }
  0xcc   : > { %p586_p5 = pneg %p585_p3  ;;  %p592_p9 = por %p591_p8, %p590_p7 }
  0xce   : > { %p593_p10 = pnand %p592_p9, %p586_p5 }
  0xd0   : > { %596 = shalt.err (!%p593_p10)
}
  0xd1   : > { %s597_s3 = scalar_lea.hbm %s218_s30, 128  ;;  %s601_s24 = scalar_lea.hbm %s884_s2, 256 }
  0xd2   : > { %p598_p11 = scmp.ne.s32.totalorder %s218_s30, %s597_s3  ;;  %p602_p0 = scmp.lt.s32.totalorder %s218_s30, %s884_s2 }
  0xd3   : > { %p603_p1 = scmp.lt.s32.totalorder %s601_s24, %s597_s3 }
  0xd4   : > { %p599_p12 = pnand %p598_p11, %p711_p4 }
  0xd5   : > { %p604_p2 = por %p603_p1, %p602_p0 }
  0xd6   : > { %p600_p13 = pneg %p599_p12 }
  0xd8   : > { %p605_p3 = pnand %p604_p2, %p600_p13 }
  0xda   : > { %608 = shalt.err (!%p605_p3)
}
  0xdb   : > { %359 = dma.vmem_to_hbm [thread:$0]  (%p711_p4), %s221_s26, 128, %s218_s30, %s207_s6  }
  0xdc PF: > { %p365_p5 = scmp.ge.s32.totalorder %s653_s14, 1  ;;  %s232_s8 = sand.u32 1, %s645_s12  }
  0xdd   : > { %s233_s16 = scalar_lea.sflag [#allocation7], %s232_s8 }
  0xde   : > { %p362_p7 = pnand %p365_p5, %p715_p6 }
  0xe0   : > { %p363_p8 = pneg %p362_p7 }
  0xe2   : > { %640 = dma.done.wait (%p363_p8), %s233_s16, 128  }
  0xe3   : > { %642 = vsyncadd (%p363_p8), %s233_s16, 4294967168  ;;  %p16_p9 = scmp.ge.s32.totalorder %s700_s15, 3   ;;  %s887_s12 = smov %s649_s13 }
  0xe4   : > { %s888_s13 = smov %s709_s18  ;;  %s889_s14 = smov %s700_s15 }
  0xe5   :  { %18 = sbr.rel (!%p16_p9) target bundleno = 8 (0x8), region = 105 }
  0xea   :  { %238 = vsyncpa [#allocation7], 1 }
  0xeb   :  { %240 = vsyncpa [#allocation7 + $0x1], 1 }
  0xec   :  { %241 = vsyncmov [#allocation3] }
  0xef   :  { %s242_s14 = vpop.sfrf %241 }
  0xf0   :  { %p351_p4 = scmp.ne.s32.totalorder %s242_s14, 0 }
  0xf2   :  { %246 = shalt.err (%p351_p4)  }
  0xf3   :  { %248 = vsyncmov [#allocation3 + $0x1] }
  0xf6   :  { %s249_s19 = vpop.sfrf %248 }
  0xf7   :  { %p352_p6 = scmp.ne.s32.totalorder %s249_s19, 0 }
  0xf9   :  { %253 = shalt.err (%p352_p6)  }
  0xfa   :  { %255 = vsyncmov [#allocation3 + $0x2] }
  0xfd   :  { %s256_s20 = vpop.sfrf %255 }
  0xfe   :  { %p353_p10 = scmp.ne.s32.totalorder %s256_s20, 0 }
 0x100   :  { %260 = shalt.err (%p353_p10)  }
 0x101   :  { %262 = vsyncmov [#allocation3 + $0x3] }
 0x104   :  { %s263_s10 = vpop.sfrf %262 }
 0x105   :  { %p354_p11 = scmp.ne.s32.totalorder %s263_s10, 0 }
 0x107   :  { %267 = shalt.err (%p354_p11)  }
 0x108   :  { %269 = vsyncmov [#allocation3 + $0x4] }
 0x10b   :  { %s270_s15 = vpop.sfrf %269 }
 0x10c   :  { %p355_p12 = scmp.ne.s32.totalorder %s270_s15, 0 }
 0x10e   :  { %274 = shalt.err (%p355_p12)  }
 0x10f   :  { %276 = vsyncmov [#allocation3 + $0x5] }
 0x112   :  { %s277_s1 = vpop.sfrf %276 }
 0x113   :  { %p356_p13 = scmp.ne.s32.totalorder %s277_s1, 0 }
 0x115   :  { %281 = shalt.err (%p356_p13)  }
 0x116   :  { %283 = vsyncmov [#allocation3 + $0x6] }
 0x119   :  { %s284_s2 = vpop.sfrf %283 }
 0x11a   :  { %p357_p0 = scmp.ne.s32.totalorder %s284_s2, 0 }
 0x11c   :  { %288 = shalt.err (%p357_p0)  }
 0x11d   :  { %290 = vsyncmov [#allocation3 + $0x7] }
 0x120   :  { %s291_s12 = vpop.sfrf %290 }
 0x121   :  { %p358_p1 = scmp.ne.s32.totalorder %s291_s12, 0 }
 0x123   :  { %295 = shalt.err (%p358_p1)  }

</bundles_post_ra>
